<compile_context>
chip_gen: v7x
topology: tpu7x:2x2x1
jax: 0.10.0
libtpu: 0.0.40
codegen_flags: <defaults>
</compile_context>

<pallas_src>
import jax
import jax.numpy as jnp
from jax.experimental import pallas as pl
from jax.experimental.pallas import tpu as pltpu

TAU = 2.0
V_TH = 1.0
BN_EPS = 1e-5


def mlp_kernel(x_ref, w1_ref, b1_ref, w2_ref, b2_ref, out_ref, v1_mem, v2_mem):
    # grid = (T,).  T is the sequential ("arbitrary") axis: LIF membrane
    # potentials live in VMEM scratch, persist across time steps, and are
    # reset at t == 0.  Do NOT mark this axis "parallel" or reorder the grid.
    t = pl.program_id(0)

    @pl.when(t == 0)
    def _():
        v1_mem[...] = jnp.zeros_like(v1_mem)
        v2_mem[...] = jnp.zeros_like(v2_mem)

    def lif(u, mem_ref):
        # spikingjelly LIFNode: charge, fire, hard reset (v_reset = 0).
        h = mem_ref[...] + (u - mem_ref[...]) * (1.0 / TAU)
        spike = (h >= V_TH).astype(jnp.float32)
        mem_ref[...] = h * (1.0 - spike)
        return spike

    x = x_ref[0]  # (B*N, C) bf16 spikes for this time step

    # fc1 (+ folded BN) -> LIF   : bf16 x bf16 matmul, f32 accumulation
    y1 = jnp.dot(x, w1_ref[...], preferred_element_type=jnp.float32) + b1_ref[...]
    s1 = lif(y1, v1_mem)

    # fc2 (+ folded BN) -> LIF   : spikes are exact in bf16
    y2 = jnp.dot(s1.astype(jnp.bfloat16), w2_ref[...],
                 preferred_element_type=jnp.float32) + b2_ref[...]
    out_ref[0] = lif(y2, v2_mem)


def mlp_forward(x, w1, b1, w2, b2):
    """x: (T,B,N,C) spikes.  w1: (C,H) bf16, b1: (1,H) f32, w2: (H,C) bf16,
    b2: (1,C) f32 — BN already folded into w/b, weights pre-transposed to
    (in, out) so the kernel does x @ w directly."""
    T, B, N, C = x.shape
    H = w1.shape[1]
    R = B * N  # collapse batch + token rows into one block (fewer grid steps)

    x2 = x.reshape(T, R, C).astype(jnp.bfloat16)  # 0/1 spikes -> exact in bf16

    const = lambda t: (0, 0)
    out = pl.pallas_call(
        mlp_kernel,
        out_shape=jax.ShapeDtypeStruct((T, R, C), jnp.float32),
        grid_spec=pltpu.PrefetchScalarGridSpec(
            num_scalar_prefetch=0,
            grid=(T,),
            in_specs=[
                pl.BlockSpec((1, R, C), lambda t: (t, 0, 0)),
                pl.BlockSpec((C, H), const),
                pl.BlockSpec((1, H), const),
                pl.BlockSpec((H, C), const),
                pl.BlockSpec((1, C), const),
            ],
            out_specs=pl.BlockSpec((1, R, C), lambda t: (t, 0, 0)),
            scratch_shapes=[pltpu.VMEM((R, H), jnp.float32),   # fc1 LIF membrane
                            pltpu.VMEM((R, C), jnp.float32)],  # fc2 LIF membrane
        ),
        # T must stay "arbitrary" (membrane carry).  On v7x (2 TensorCores) a
        # leading size-2 "parallel" axis splitting the R rows would occupy the
        # second core; omitted at this toy size (pure overhead on v5e/v6e).
        compiler_params=pltpu.CompilerParams(
            dimension_semantics=("arbitrary",)),
    )(x2, w1, b1, w2, b2)
    return out.reshape(T, B, N, C)


# ----------------------- pure-JAX reference -------------------------------
def mlp_ref(x, w1, b1, w2, b2):
    # f32 reference with the same (BN-folded, bf16-quantized) weights; only
    # f32 accumulation order differs from the kernel.
    P = jax.lax.Precision.HIGHEST

    def lif_over_time(u):
        def step(v, ut):
            h = v + (ut - v) / TAU
            s = (h >= V_TH).astype(jnp.float32)
            return h * (1.0 - s), s
        _, spikes = jax.lax.scan(step, jnp.zeros_like(u[0]), u)
        return spikes

    y1 = jnp.einsum("tbnc,ch->tbnh", x, w1, precision=P) + b1
    s1 = lif_over_time(y1)
    y2 = jnp.einsum("tbnh,hc->tbnc", s1, w2, precision=P) + b2
    return lif_over_time(y2)


def fold_linear_bn(key, in_dim, out_dim):
    """Synthetic Linear + eval-mode BatchNorm1d, folded into (w, b)."""
    kw, kb, kg, kbe, km, kv = jax.random.split(key, 6)
    w = jax.random.normal(kw, (out_dim, in_dim), jnp.float32) / jnp.sqrt(in_dim)
    b = 0.1 * jax.random.normal(kb, (out_dim,), jnp.float32)
    gamma = 1.0 + 0.1 * jax.random.normal(kg, (out_dim,), jnp.float32)
    beta = 0.1 * jax.random.normal(kbe, (out_dim,), jnp.float32)
    rmean = 0.1 * jax.random.normal(km, (out_dim,), jnp.float32)
    rvar = jax.random.uniform(kv, (out_dim,), jnp.float32, minval=0.5, maxval=1.5)
    # TODO(synk): PyTorch *training*-mode BatchNorm1d would use batch
    # statistics; this folds eval-mode running stats (standard for inference).
    scale = gamma / jnp.sqrt(rvar + BN_EPS)
    shift = beta - rmean * scale
    w_folded = w.T * scale[None, :]                # (in, out): y = x @ w + b
    b_folded = (b * scale + shift).reshape(1, out_dim)
    return w_folded, b_folded


if __name__ == "__main__":
    T, B, N, C = 4, 2, 8, 32
    H = 4 * C  # mlp_ratio = 4 -> hidden = 128 (lane-dense fc1 activation)

    key = jax.random.PRNGKey(0)
    kx, k1, k2 = jax.random.split(key, 3)

    # MLP input in SpikeViT is the previous block's spike output -> binary.
    x = (jax.random.uniform(kx, (T, B, N, C)) < 0.5).astype(jnp.float32)

    w1_f32, b1 = fold_linear_bn(k1, C, H)
    w2_f32, b2 = fold_linear_bn(k2, H, C)

    # Quantize folded weights once to bf16 for the MXU; the reference uses the
    # same quantized values (in f32), so only accumulation order can differ.
    w1_bf16 = w1_f32.astype(jnp.bfloat16)
    w2_bf16 = w2_f32.astype(jnp.bfloat16)

    out = jax.block_until_ready(mlp_forward(x, w1_bf16, b1, w2_bf16, b2))
    ref = jax.block_until_ready(
        mlp_ref(x, w1_bf16.astype(jnp.float32), b1,
                w2_bf16.astype(jnp.float32), b2))

    assert out.shape == (T, B, N, C)
    assert bool(jnp.all(jnp.isfinite(out)))
    # Outputs are 0/1 spikes; tolerate a vanishingly small flip rate from f32
    # accumulation-order differences right at the LIF threshold, but catch any
    # real bug (which would flip a large fraction of spikes).
    flip_rate = float(jnp.mean(jnp.abs(out - ref)))
    assert flip_rate < 0.02, f"spike mismatch rate too high: {flip_rate}"

    print("KERNEL_OK")
</pallas_src>

<mosaic_0001>
module attributes {stable_mosaic.version = 11 : i64} {
  func.func @mlp_kernel(%arg0: i32, %arg1: memref<1x16x32xbf16, #tpu.memory_space<vmem>>, %arg2: memref<32x128xbf16, #tpu.memory_space<vmem>>, %arg3: memref<1x128xf32, #tpu.memory_space<vmem>>, %arg4: memref<128x32xbf16, #tpu.memory_space<vmem>>, %arg5: memref<1x32xf32, #tpu.memory_space<vmem>>, %arg6: memref<1x16x32xf32, #tpu.memory_space<vmem>>, %arg7: memref<16x128xf32, #tpu.memory_space<vmem>>, %arg8: memref<16x32xf32, #tpu.memory_space<vmem>>) attributes {dimension_semantics = [#tpu.dimension_semantics<arbitrary>], iteration_bounds = array<i64: 4>, scalar_prefetch = 0 : i64, scratch_operands = 2 : i64, tpu.core_type = #tpu.core_type<tc>, window_params = [{transform_indices = @transform_0, window_bounds = array<i64: 1, 16, 32>}, {pipeline_mode = #tpu.pipeline_mode<synchronous>, transform_indices = @transform_1, window_bounds = array<i64: 32, 128>}, {pipeline_mode = #tpu.pipeline_mode<synchronous>, transform_indices = @transform_2, window_bounds = array<i64: 1, 128>}, {pipeline_mode = #tpu.pipeline_mode<synchronous>, transform_indices = @transform_3, window_bounds = array<i64: 128, 32>}, {pipeline_mode = #tpu.pipeline_mode<synchronous>, transform_indices = @transform_4, window_bounds = array<i64: 1, 32>}, {transform_indices = @transform_5, window_bounds = array<i64: 1, 16, 32>}]} {
    %c0_i32 = arith.constant 0 : i32
    %0 = arith.cmpi eq, %arg0, %c0_i32 : i32
    %1 = arith.extui %0 : i1 to i32
    %c0_i32_0 = arith.constant 0 : i32
    %2 = arith.cmpi ne, %1, %c0_i32_0 : i32
    scf.if %2 {
      %cst_33 = arith.constant 0.000000e+00 : f32
      %47 = vector.broadcast %cst_33 : f32 to vector<16x128xf32>
      %c0_34 = arith.constant 0 : index
      %c0_35 = arith.constant 0 : index
      %48 = vector.load %arg7[%c0_34, %c0_35] : memref<16x128xf32, #tpu.memory_space<vmem>>, vector<16x128xf32>
      tpu.vector_store %arg7[%c0_34, %c0_35], %47 {strides = array<i32>} : memref<16x128xf32, #tpu.memory_space<vmem>>, vector<16x128xf32>,
      %cst_36 = arith.constant 0.000000e+00 : f32
      %49 = vector.broadcast %cst_36 : f32 to vector<16x32xf32>
      %c0_37 = arith.constant 0 : index
      %c0_38 = arith.constant 0 : index
      %50 = vector.load %arg8[%c0_37, %c0_38] : memref<16x32xf32, #tpu.memory_space<vmem>>, vector<16x32xf32>
      tpu.vector_store %arg8[%c0_37, %c0_38], %49 {strides = array<i32>} : memref<16x32xf32, #tpu.memory_space<vmem>>, vector<16x32xf32>,
    } else {
    }
    %c0 = arith.constant 0 : index
    %c0_1 = arith.constant 0 : index
    %c0_2 = arith.constant 0 : index
    %3 = vector.load %arg1[%c0, %c0_1, %c0_2] : memref<1x16x32xbf16, #tpu.memory_space<vmem>>, vector<1x16x32xbf16>
    %4 = vector.shape_cast %3 : vector<1x16x32xbf16> to vector<16x32xbf16>
    %c0_3 = arith.constant 0 : index
    %c0_4 = arith.constant 0 : index
    %5 = vector.load %arg2[%c0_3, %c0_4] : memref<32x128xbf16, #tpu.memory_space<vmem>>, vector<32x128xbf16>
    %cst = arith.constant dense<0.000000e+00> : vector<16x128xf32>
    %6 = tpu.matmul %4, %5, %cst {dimension_numbers = #tpu.dot_dimension_numbers<[1], [0], [0], [1], [0, 0, 1, 1], [], []>} : vector<16x32xbf16>, vector<32x128xbf16>, vector<16x128xf32> -> vector<16x128xf32>
    %c0_5 = arith.constant 0 : index
    %c0_6 = arith.constant 0 : index
    %7 = vector.load %arg3[%c0_5, %c0_6] : memref<1x128xf32, #tpu.memory_space<vmem>>, vector<1x128xf32>
    %8 = vector.broadcast %7 : vector<1x128xf32> to vector<16x128xf32>
    %9 = arith.addf %6, %8 : vector<16x128xf32>
    %c0_7 = arith.constant 0 : index
    %c0_8 = arith.constant 0 : index
    %10 = vector.load %arg7[%c0_7, %c0_8] : memref<16x128xf32, #tpu.memory_space<vmem>>, vector<16x128xf32>
    %c0_9 = arith.constant 0 : index
    %c0_10 = arith.constant 0 : index
    %11 = vector.load %arg7[%c0_9, %c0_10] : memref<16x128xf32, #tpu.memory_space<vmem>>, vector<16x128xf32>
    %12 = arith.subf %9, %11 : vector<16x128xf32>
    %cst_11 = arith.constant 5.000000e-01 : f32
    %13 = vector.broadcast %cst_11 : f32 to vector<16x128xf32>
    %14 = arith.mulf %12, %13 : vector<16x128xf32>
    %15 = arith.addf %10, %14 : vector<16x128xf32>
    %cst_12 = arith.constant 1.000000e+00 : f32
    %16 = vector.broadcast %cst_12 : f32 to vector<16x128xf32>
    %17 = arith.cmpf oge, %15, %16 : vector<16x128xf32>
    %18 = arith.extui %17 : vector<16x128xi1> to vector<16x128xi32>
    %19 = arith.sitofp %18 : vector<16x128xi32> to vector<16x128xf32>
    %cst_13 = arith.constant 1.000000e+00 : f32
    %20 = vector.broadcast %cst_13 : f32 to vector<16x128xf32>
    %21 = arith.subf %20, %19 : vector<16x128xf32>
    %22 = arith.mulf %15, %21 : vector<16x128xf32>
    %c0_14 = arith.constant 0 : index
    %c0_15 = arith.constant 0 : index
    %23 = vector.load %arg7[%c0_14, %c0_15] : memref<16x128xf32, #tpu.memory_space<vmem>>, vector<16x128xf32>
    tpu.vector_store %arg7[%c0_14, %c0_15], %22 {strides = array<i32>} : memref<16x128xf32, #tpu.memory_space<vmem>>, vector<16x128xf32>,
    %24 = arith.truncf %19 : vector<16x128xf32> to vector<16x128xbf16>
    %c0_16 = arith.constant 0 : index
    %c0_17 = arith.constant 0 : index
    %25 = vector.load %arg4[%c0_16, %c0_17] : memref<128x32xbf16, #tpu.memory_space<vmem>>, vector<128x32xbf16>
    %cst_18 = arith.constant dense<0.000000e+00> : vector<16x32xf32>
    %26 = tpu.matmul %24, %25, %cst_18 {dimension_numbers = #tpu.dot_dimension_numbers<[1], [0], [0], [1], [0, 0, 1, 1], [], []>} : vector<16x128xbf16>, vector<128x32xbf16>, vector<16x32xf32> -> vector<16x32xf32>
    %c0_19 = arith.constant 0 : index
    %c0_20 = arith.constant 0 : index
    %27 = vector.load %arg5[%c0_19, %c0_20] : memref<1x32xf32, #tpu.memory_space<vmem>>, vector<1x32xf32>
    %28 = vector.broadcast %27 : vector<1x32xf32> to vector<16x32xf32>
    %29 = arith.addf %26, %28 : vector<16x32xf32>
    %c0_21 = arith.constant 0 : index
    %c0_22 = arith.constant 0 : index
    %30 = vector.load %arg8[%c0_21, %c0_22] : memref<16x32xf32, #tpu.memory_space<vmem>>, vector<16x32xf32>
    %c0_23 = arith.constant 0 : index
    %c0_24 = arith.constant 0 : index
    %31 = vector.load %arg8[%c0_23, %c0_24] : memref<16x32xf32, #tpu.memory_space<vmem>>, vector<16x32xf32>
    %32 = arith.subf %29, %31 : vector<16x32xf32>
    %cst_25 = arith.constant 5.000000e-01 : f32
    %33 = vector.broadcast %cst_25 : f32 to vector<16x32xf32>
    %34 = arith.mulf %32, %33 : vector<16x32xf32>
    %35 = arith.addf %30, %34 : vector<16x32xf32>
    %cst_26 = arith.constant 1.000000e+00 : f32
    %36 = vector.broadcast %cst_26 : f32 to vector<16x32xf32>
    %37 = arith.cmpf oge, %35, %36 : vector<16x32xf32>
    %38 = arith.extui %37 : vector<16x32xi1> to vector<16x32xi32>
    %39 = arith.sitofp %38 : vector<16x32xi32> to vector<16x32xf32>
    %cst_27 = arith.constant 1.000000e+00 : f32
    %40 = vector.broadcast %cst_27 : f32 to vector<16x32xf32>
    %41 = arith.subf %40, %39 : vector<16x32xf32>
    %42 = arith.mulf %35, %41 : vector<16x32xf32>
    %c0_28 = arith.constant 0 : index
    %c0_29 = arith.constant 0 : index
    %43 = vector.load %arg8[%c0_28, %c0_29] : memref<16x32xf32, #tpu.memory_space<vmem>>, vector<16x32xf32>
    tpu.vector_store %arg8[%c0_28, %c0_29], %42 {strides = array<i32>} : memref<16x32xf32, #tpu.memory_space<vmem>>, vector<16x32xf32>,
    %c0_30 = arith.constant 0 : index
    %c0_31 = arith.constant 0 : index
    %c0_32 = arith.constant 0 : index
    %44 = vector.load %arg6[%c0_30, %c0_31, %c0_32] : memref<1x16x32xf32, #tpu.memory_space<vmem>>, vector<1x16x32xf32>
    %45 = vector.shape_cast %44 : vector<1x16x32xf32> to vector<16x32xf32>
    %46 = vector.shape_cast %39 : vector<16x32xf32> to vector<1x16x32xf32>
    tpu.vector_store %arg6[%c0_30, %c0_31, %c0_32], %46 {strides = array<i32>} : memref<1x16x32xf32, #tpu.memory_space<vmem>>, vector<1x16x32xf32>,
    return
  }
  func.func @transform_0(%arg0: i32) -> (i32, i32, i32) {
    %c0_i32 = arith.constant 0 : i32
    %c0_i32_0 = arith.constant 0 : i32
    %c0_i32_1 = arith.constant 0 : i32
    return %arg0, %c0_i32, %c0_i32_0 : i32, i32, i32
  }
  func.func @transform_1(%arg0: i32) -> (i32, i32) {
    %c0_i32 = arith.constant 0 : i32
    %c0_i32_0 = arith.constant 0 : i32
    %c0_i32_1 = arith.constant 0 : i32
    return %c0_i32, %c0_i32_0 : i32, i32
  }
  func.func @transform_2(%arg0: i32) -> (i32, i32) {
    %c0_i32 = arith.constant 0 : i32
    %c0_i32_0 = arith.constant 0 : i32
    %c0_i32_1 = arith.constant 0 : i32
    return %c0_i32, %c0_i32_0 : i32, i32
  }
  func.func @transform_3(%arg0: i32) -> (i32, i32) {
    %c0_i32 = arith.constant 0 : i32
    %c0_i32_0 = arith.constant 0 : i32
    %c0_i32_1 = arith.constant 0 : i32
    return %c0_i32, %c0_i32_0 : i32, i32
  }
  func.func @transform_4(%arg0: i32) -> (i32, i32) {
    %c0_i32 = arith.constant 0 : i32
    %c0_i32_0 = arith.constant 0 : i32
    %c0_i32_1 = arith.constant 0 : i32
    return %c0_i32, %c0_i32_0 : i32, i32
  }
  func.func @transform_5(%arg0: i32) -> (i32, i32, i32) {
    %c0_i32 = arith.constant 0 : i32
    %c0_i32_0 = arith.constant 0 : i32
    %c0_i32_1 = arith.constant 0 : i32
    return %arg0, %c0_i32, %c0_i32_0 : i32, i32, i32
  }
}

</mosaic_0001>

<bundles_post_ra>
// kernel: tpu_custom_call.1
= control target key start
LH: loop header
LB: loop body
LE: loop exit
PB: predicated region body
PF: predicated region fallthrough
CT: control target
= control target key end

     0   :  { %10 = vsyncpa [#allocation5], 0  ;;  %s941_s0 = inlined_call_operand.vmem [shape: bf16[4,16,32], index: 0, kind: input, shape index: {}]   ;;  %s942_s1 = inlined_call_operand.vmem [shape: bf16[32,128], index: 1, kind: input, shape index: {}]   ;;  %s943_s2 = inlined_call_operand.vmem [shape: f32[1,128], index: 2, kind: input, shape index: {}]   ;;  %s944_s3 = inlined_call_operand.vmem [shape: bf16[128,32], index: 3, kind: input, shape index: {}]   ;;  %s945_s4 = inlined_call_operand.vmem [shape: f32[1,32], index: 4, kind: input, shape index: {}]   ;;  %s946_s5 = inlined_call_operand.hbm [shape: f32[4,16,32], index: 5, kind: output, shape index: {}]  }
   0x1   :  { %12 = vsyncpa [#allocation5 + $0x1], 0  ;;  %s771_s18 = smov 0   ;;  %s773_s19 = smov 0  }
   0x2   :  { %s775_s20 = smov 0   ;;  %s777_s21 = smov 0  }
   0x3 LB: > { %s792_s22 = sadd.s32 4294967295, %s732_s21   ;;  %s539_s23 = sadd.s32 4294967294, %s732_s21   ;;  %s732_s21 = sphi %s777_s21, %s952_s21   ;;  %s728_s20 = sphi %s775_s20, %s951_s20   ;;  %s724_s19 = sphi %s773_s19, %s950_s19   ;;  %s720_s18 = sphi %s771_s18, %s949_s18  }
   0x4   : > { %s796_s24 = sadd.s32 1, %s732_s21   ;;  %s135_s25 = sadd.s32 1, %s728_s20 }
   0x5   : > { %s132_s26 = ssub.s32 %s732_s21, %s796_s24  ;;  %p145_p0 = scmp.ne.s32.totalorder %s728_s20, %s724_s19 }
   0x6   : > { %p133_p1 = scmp.eq.s32.totalorder %s132_s26, 0  ;;  %p146_p2 = scmp.eq.s32.totalorder %s792_s22, 3 }
   0x7   : > { %p151_p3 = scmp.ne.s32.totalorder %s724_s19, %s720_s18  ;;  %p152_p4 = scmp.eq.s32.totalorder %s539_s23, 3 }
   0x8   : > { %s807_s27 = scalar_select %p133_p1, %s728_s20, %s135_s25  }
   0x9   : > { %p809_p5 = por %p146_p2, %p145_p0  ;;  %p813_p6 = por %p152_p4, %p151_p3 }
   0xa   : > { %p542_p7 = scmp.ge.s32.totalorder %s732_s21, 1  ;;  %p190_p8 = scmp.lt.s32.totalorder %s732_s21, 5 }
   0xc   : > { %p191_p9 = pnand %p542_p7, %p190_p8 }
   0xd   : > { %s215_s30 = sand.u32 (!%p191_p9), 1, %s724_s19   ;;  %p218_p10 = scmp.lt.s32.totalorder (!%p191_p9), %s792_s22, 3 }
   0xe   : > { %194 = sbr.rel (%p191_p9) target bundleno = 502 (0x1f6), region = 40  ;;  %s543_s6 = sshll.u32 (!%p191_p9), %s215_s30, 4 }
   0xf   : > { %s827_s12 = scalar_lea.vmem (!%p191_p9), [#allocation4], %s543_s6  ;;  %p546_p11 = scmp.ne.s32.totalorder (!%p191_p9), %s792_s22, 0 }
  0x15   : > { %s219_s7 = scalar_select %p218_p10, %s792_s22, 3 }
  0x16   : > { %227 = sbr.rel (%p546_p11) target bundleno = 29 (0x1d), region = 44  ;;  %vm230_vm0 = vcmask (!%p546_p11), 261120   ;;  %v734_v0 = vmov (!%p546_p11), 0.0  }
  0x17   : > { %s572_s8 = sshll.u32 %s219_s7, 3  ;;  %228 = vst [vmem:[#allocation2] sm:$0xff] (!%p546_p11), %v734_v0  ;;  %229 = vst [vmem:[#allocation2 + $0x8] sm:$0xff] (!%p546_p11), %v734_v0 }
  0x18   : > { %s222_s11 = scalar_lea.vmem %s941_s0, %s572_s8  ;;  %231 = vst.msk [vmem:[#allocation3] sm:$0xff] (!%p546_p11), %vm230_vm0, %v734_v0  ;;  %232 = vst.msk [vmem:[#allocation3 + $0x8] sm:$0xff] (!%p546_p11), %vm230_vm0, %v734_v0 }
  0x1d PF: > { %v659_v1 = vld [vmem:[%s942_s1] sm:$0xff]   ;;  %v735_v2 = vmov 0.0   ;;  %v660_v3 = vld [vmem:[%s942_s1 + $0x8] sm:$0xff]   ;;  %vm736_vm1 = vmmov 0   ;;  %vm263_vm2 = vcmask 261120   ;;  %v664_v7 = vld [vmem:[%s944_s3 + $0x10] sm:$0xff]  }
  0x1e   : > { %586 = vmatprep.subr.bf16.mxu0 %v735_v2  ;;  %594 = vmatprep.subr.bf16.mxu1 %v735_v2  ;;  %v662_v4 = vld [vmem:[%s944_s3] sm:$0xff]   ;;  %v663_v6 = vld [vmem:[%s944_s3 + $0x8] sm:$0xff]   ;;  %v665_v8 = vld [vmem:[%s944_s3 + $0x18] sm:$0xff]   ;;  %v737_v33 = vmov 1.0|1.0   ;;  %s573_s8 = sshll.u32 %s792_s22, 8 }
  0x1f   : > { %587 = vmatpush3.bf16.msra.mxu0 %v659_v1  ;;  %590 = vmatprep.mubr.msk.bf16.mxu0 %vm736_vm1, %v735_v2  ;;  %v661_v5 = vld [vmem:[%s222_s11] sm:$0xff]   ;;  %v667_v10 = vld [vmem:[%s944_s3 + $0x28] sm:$0xff]   ;;  %v668_v11 = vld [vmem:[%s944_s3 + $0x30] sm:$0xff]   ;;  %s477_s9 = sshll.u32 %s827_s12, 4  ;;  %s887_s13 = scalar_lea.hbm %s946_s5, %s573_s8  ;;  %s889_s9 = int_to_ptr.vmem [resolvable:$true] %s477_s9 }
  0x20   : > { %588 = vmatprep.subr.bf16.mxu0 %v735_v2  ;;  %610 = vmatprep.mubr.msk.bf16.mxu1 %vm736_vm1, %v735_v2  ;;  %v666_v9 = vld [vmem:[%s944_s3 + $0x20] sm:$0xff]   ;;  %v669_v12 = vld [vmem:[%s944_s3 + $0x38] sm:$0xff]   ;;  %v309_v19 = vld [vmem:[#allocation2 + $0x8] sm:$0xff]  ;;  %s898_s22 = scalar_lea.sflag [#allocation5], %s215_s30  ;;  %s670_s14 = scalar_lea.vmem %s889_s9, 256 }
  0x21   : > { %595 = vmatpush3.bf16.msra.mxu1 %v662_v4  ;;  %v547_v13 = vld [vmem:[%s943_s2] ss:$0 sm:$0xff]  ;;  %v441_v37 = vld [vmem:[#allocation3] sm:$0xff]  ;;  %v442_v41 = vld [vmem:[#allocation3 + $0x8] sm:$0xff]  ;;  %p671_p12 = scmp.ne.s32.totalorder %s889_s9, %s670_s14  ;;  %s738_s15 = smov [#allocation4]  }
  0x22   : > { %596 = vmatprep.subr.bf16.mxu1 %v735_v2  ;;  %v308_v15 = vld [vmem:[#allocation2] sm:$0xff]  ;;  %s674_s16 = sshll.u32 %s738_s15, 4  ;;  %s675_s16 = int_to_ptr.vmem [resolvable:$false] %s674_s16 }
  0x23   : > { %589 = vmatpush3.bf16.msra.mxu0 %v660_v3  ;;  %v554_v35 = vld [vmem:[%s945_s4] ss:$0 sm:$0xff]  ;;  %p672_p13 = pnand %p671_p12, %p809_p5  ;;  %s676_s17 = scalar_lea.vmem %s675_s16, 512 }
  0x24   : > { %p677_p1 = scmp.lt.s32.totalorder %s889_s9, %s675_s16  ;;  %p678_p2 = scmp.lt.s32.totalorder %s676_s17, %s670_s14 }
  0x25   : > { %597 = vmatpush3.bf16.msra.mxu1 %v663_v6  ;;  %p673_p0 = pneg %p672_p13 }
  0x26   : > { %591 = vmatmul.mubr.msk.bf16.vlgmr.msra.gmra.mrb[0].mxu0 %vm263_vm2, %v661_v5  ;;  %598 = vmatprep.subr.bf16.mxu1 %v735_v2  ;;  %p679_p3 = por %p678_p2, %p677_p1 }
  0x28   : > { %p680_p4 = pnand %p679_p3, %p673_p0 }
  0x29   : > { %599 = vmatpush3.bf16.msra.mxu1 %v664_v7 }
  0x2a   : > { %600 = vmatprep.subr.bf16.mxu1 %v735_v2 }
  0x2d   : > { %601 = vmatpush3.bf16.msra.mxu1 %v665_v8 }
  0x2e   : > { %602 = vmatprep.subr.bf16.mxu1 %v735_v2 }
  0x31   : > { %603 = vmatpush3.bf16.msra.mxu1 %v666_v9 }
  0x32   : > { %604 = vmatprep.subr.bf16.mxu1 %v735_v2 }
  0x35   : > { %605 = vmatpush3.bf16.msra.mxu1 %v667_v10 }
  0x36   : > { %606 = vmatprep.subr.bf16.mxu1 %v735_v2 }
  0x39   : > { %607 = vmatpush3.bf16.msra.mxu1 %v668_v11 }
  0x3a   : > { %608 = vmatprep.subr.bf16.mxu1 %v735_v2 }
  0x3d   : > { %609 = vmatpush3.bf16.msra.mxu1 %v669_v12 }
  0xf9   : > { %v301_v14 = vpop.f32.mrb[0].mxu0 }
  0xfa   : > { %v302_v16 = vadd.f32 %v547_v13, %v301_v14  ;;  %v592_v17 = vpop.f32.mrb[1].mxu0 }
  0xfb   : > { %v304_v18 = vpop.f32.mrb[2].mxu0 }
  0xfc   : > { %v310_v20 = vsub.f32 %v302_v16, %v308_v15  ;;  %v305_v21 = vadd.f32 %v547_v13, %v304_v18  ;;  %v593_v22 = vpop.f32.mrb[3].mxu0 }
  0xfe   : > { %v312_v23 = vmul.f32 0.5, %v310_v20  ;;  %v311_v24 = vsub.f32 %v305_v21, %v309_v19 }
 0x100   : > { %v314_v25 = vadd.f32 %v312_v23, %v308_v15  ;;  %v313_v26 = vmul.f32 0.5, %v311_v24 }
 0x102   : > { %v315_v27 = vadd.f32 %v313_v26, %v309_v19  ;;  %vm316_vm3 = vcmp.ge.f32.partialorder %v314_v25, 1.0 }
 0x103   : > { %v552_v28 = vsel %vm316_vm3, 1.0, %v735_v2 }
 0x104   : > { %vm317_vm4 = vcmp.ge.f32.partialorder %v315_v27, 1.0  ;;  %v322_v29 = vsub.f32 1.0, %v552_v28 }
 0x105   : > { %v553_v30 = vsel %vm317_vm4, 1.0, %v735_v2  ;;  %vm563_vm5 = vmpackc.low %vm317_vm4, %vm316_vm3 }
 0x106   : > { %v323_v31 = vsub.f32 1.0, %v553_v30  ;;  %v324_v32 = vmul.f32 %v322_v29, %v314_v25  ;;  %611 = vmatmul.mubr.msk.bf16.vlgmr.msra.gmra.mrb[0].mxu1 %vm563_vm5, %v737_v33 }
 0x108   : > { %v325_v34 = vmul.f32 %v323_v31, %v315_v27  ;;  %326 = vst [vmem:[#allocation2] sm:$0xff] %v324_v32 }
 0x10a   : > { %327 = vst [vmem:[#allocation2 + $0x8] sm:$0xff] %v325_v34 }
 0x1d9   : > { %v434_v36 = vpop.f32.mrb[0].mxu1 }
 0x1da   : > { %v435_v38 = vadd.f32 %v554_v35, %v434_v36  ;;  %v612_v39 = vpop.f32.mrb[1].mxu1 }
 0x1db   : > { %v437_v40 = vpop.f32.mrb[2].mxu1 }
 0x1dc   : > { %v443_v42 = vsub.f32 %v435_v38, %v441_v37  ;;  %v438_v43 = vadd.f32 %v554_v35, %v437_v40  ;;  %v613_v44 = vpop.f32.mrb[3].mxu1 }
 0x1de   : > { %v445_v45 = vmul.f32 0.5, %v443_v42  ;;  %v444_v46 = vsub.f32 %v438_v43, %v442_v41 }
 0x1e0   : > { %v447_v47 = vadd.f32 %v445_v45, %v441_v37  ;;  %v446_v48 = vmul.f32 0.5, %v444_v46 }
 0x1e2   : > { %vm449_vm6 = vcmp.ge.f32.partialorder %v447_v47, 1.0  ;;  %v448_v49 = vadd.f32 %v446_v48, %v442_v41 }
 0x1e3   : > { %v565_v50 = vsel %vm449_vm6, 1.0, %v735_v2 }
 0x1e4   : > { %v455_v51 = vsub.f32 1.0, %v565_v50  ;;  %461 = vst.msk [vmem:[%s827_s12] sm:$0xff] %vm263_vm2, %v565_v50  ;;  %vm450_vm7 = vcmp.ge.f32.partialorder %v448_v49, 1.0 }
 0x1e5   : > { %v566_v52 = vsel %vm450_vm7, 1.0, %v735_v2 }
 0x1e6   : > { %v457_v53 = vmul.f32 %v455_v51, %v447_v47  ;;  %v456_v54 = vsub.f32 1.0, %v566_v52  ;;  %462 = vst.msk [vmem:[%s827_s12 + $0x8] sm:$0xff] %vm263_vm2, %v566_v52 }
 0x1e7   : > { %683 = shalt.err (!%p680_p4)
}
 0x1e8   : > { %s684_s30 = scalar_lea.hbm %s887_s13, 256  ;;  %s688_s25 = scalar_lea.hbm %s946_s5, 1024 }
 0x1e9   : > { %p685_p7 = scmp.ne.s32.totalorder %s887_s13, %s684_s30  ;;  %p689_p10 = scmp.lt.u32.totalorder %s887_s13, %s946_s5 }
 0x1ea   : > { %p690_p11 = scmp.lt.u32.totalorder %s688_s25, %s684_s30  ;;  %p692_p13 = scmp.lt.u32.totalorder %s684_s30, %s887_s13 }
 0x1eb   : > { %p686_p8 = pnand %p685_p7, %p809_p5 }
 0x1ec   : > { %p691_p12 = por %p690_p11, %p689_p10 }
 0x1ed   : > { %p687_p9 = pneg %p686_p8 }
 0x1ee   : > { %p693_p0 = por %p692_p13, %p691_p12 }
 0x1f0   : > { %p694_p1 = pnand %p693_p0, %p687_p9 }
 0x1f2   : > { %697 = shalt.err (!%p694_p1)
}
 0x1f3   : > { %s739_s7 = smov 128   ;;  %s740_s8 = smov 8   ;;  %459 = vst.msk [vmem:[#allocation3] sm:$0xff] %vm263_vm2, %v457_v53  ;;  %v458_v55 = vmul.f32 %v456_v54, %v448_v49 }
 0x1f4   : > { %614 = dma.vmem_to_hbm [thread:$0]  (%p809_p5), %s889_s9, 256, %s887_s13, %s898_s22, %s739_s7, %s739_s7, %s740_s8  }
 0x1f5   : > { %460 = vst.msk [vmem:[#allocation3 + $0x8] sm:$0xff] %vm263_vm2, %v458_v55 }
 0x1f6 PF: > { %p620_p2 = scmp.ge.s32.totalorder %s732_s21, 2  ;;  %s492_s10 = sand.u32 1, %s720_s18  }
 0x1f7   : > { %s493_s11 = scalar_lea.sflag [#allocation5], %s492_s10 }
 0x1f8   : > { %p617_p3 = pnand %p620_p2, %p813_p6 }
 0x1fa   : > { %715 = dma.done.wait (!%p617_p3), %s493_s11, 256  }
 0x1fb   : > { %717 = vsyncadd (!%p617_p3), %s493_s11, 4294967040  ;;  %p15_p5 = scmp.ge.s32.totalorder %s796_s24, 6   ;;  %s949_s18 = smov %s724_s19 }
 0x1fc   : > { %s950_s19 = smov %s728_s20  ;;  %s951_s20 = smov %s807_s27 }
 0x1fd   : > { %s952_s21 = smov %s796_s24  ;;  %17 = sbr.rel (!%p15_p5) target bundleno = 3 (0x3), region = 79 }
 0x204   :  { %498 = vsyncpa [#allocation5], 1 }
 0x205   :  { %500 = vsyncpa [#allocation5 + $0x1], 1 }

</bundles_post_ra>
